<compile_context>
chip_gen: v5e
topology: v5e:2x2
jax: 0.10.0
libtpu: 0.0.40
codegen_flags: <defaults>
</compile_context>

<pallas_src>
import functools

import jax
import jax.numpy as jnp
from jax import lax
from jax.experimental import pallas as pl
from jax.experimental.pallas import tpu as pltpu

EPS = 1e-5
LANE = 128
VMEM_LIMIT_BYTES = 48 * 1024 * 1024  # <= v7x 64 MiB physical; > default scoped limits on v5e/v6e


def _residual_mlp_kernel(x_res_ref, x_mm_ref, w_ref, b_ref, g_ref, be_ref,
                         o_ref, *, inv_n):
    # Linear: h = x @ W_t + b.  W_t was pre-transposed ONCE to (in, out) layout,
    # so this is a plain row-major contraction on the MXU (no in-kernel transpose).
    h = lax.dot_general(x_mm_ref[...], w_ref[...],
                        dimension_numbers=(((1,), (0,)), ((), ())),
                        preferred_element_type=jnp.float32)
    h = h + b_ref[...]

    # f(f(.)) with f = ReLU, kept as two maxima to mirror the module structure
    # (ReLU is idempotent; the second max is ~free on the VPU).
    h = jnp.maximum(h, 0.0)
    h = jnp.maximum(h, 0.0)

    # BatchNorm1d, training-mode batch statistics (biased variance).
    # Two-pass mean/variance for numerical safety (h is resident in VMEM);
    # affine is folded into one per-feature scale/shift.
    mean = jnp.sum(h, axis=0, keepdims=True) * inv_n        # (1, tile_s)
    d = h - mean
    var = jnp.sum(d * d, axis=0, keepdims=True) * inv_n     # (1, tile_s)
    scale = g_ref[...] * lax.rsqrt(var + EPS)               # gamma / sqrt(var+eps)
    shift = be_ref[...] - mean * scale                      # beta - mean*scale
    h = h * scale + shift

    # final f + residual add (exact f32 residual tile, streamed per feature block)
    o_ref[...] = x_res_ref[...] + jnp.maximum(h, 0.0)


def _choose_tile_s(s_pad, n, mm_bytes, budget_bytes):
    """Largest feature-tile width (multiple of 128 dividing s_pad) whose
    per-step VMEM footprint fits the budget, preferring widths that keep
    >= 2 grid steps so both v7x TensorCores get work on the 'parallel' axis."""
    def footprint(t):
        return (2 * t * s_pad * mm_bytes      # W_t slab, double-buffered
                + 2 * n * s_pad * mm_bytes    # resident x (matmul dtype), worst case 2 bufs
                + 2 * n * t * 4               # residual x tile, double-buffered
                + 2 * n * t * 4               # output tile, double-buffered
                + 6 * t * 4)                  # bias/gamma/beta vectors
    cands = [t for t in range(LANE, s_pad + 1, LANE) if s_pad % t == 0]
    fitting = [t for t in cands if footprint(t) <= budget_bytes] or [LANE]
    multi = [t for t in fitting if s_pad // t >= 2]
    pool = multi or fitting
    return max(pool)


def prepare_params(weight, bias, gamma, beta, *, matmul_dtype=jnp.bfloat16):
    """One-time (per parameter set) prep, deliberately OUT of the per-call path:
    pad features to a multiple of 128, transpose W to (in, out), cast to the
    matmul dtype.  Reuse the returned dict across calls."""
    s = weight.shape[0]
    assert weight.shape == (s, s)
    s_pad = pl.cdiv(s, LANE) * LANE
    pad = s_pad - s
    w_t = jnp.transpose(weight)                     # (in, out); static, done once
    if pad:
        w_t = jnp.pad(w_t, ((0, pad), (0, pad)))
        bias = jnp.pad(bias, (0, pad))
        gamma = jnp.pad(gamma, (0, pad))
        beta = jnp.pad(beta, (0, pad))
    return {
        "w_t": w_t.astype(matmul_dtype),
        "bias": bias.reshape(1, s_pad).astype(jnp.float32),
        "gamma": gamma.reshape(1, s_pad).astype(jnp.float32),
        "beta": beta.reshape(1, s_pad).astype(jnp.float32),
        "size": s,
        "s_pad": s_pad,
        "matmul_dtype": matmul_dtype,
    }


def residual_mlp(x, params, *, tile_s=None, vmem_limit_bytes=VMEM_LIMIT_BYTES):
    """x: (N, S) f32; params: output of prepare_params()."""
    n, s = x.shape
    assert s == params["size"], "x feature dim must match prepared params"
    s_pad = params["s_pad"]
    mm_dtype = params["matmul_dtype"]
    mm_bytes = jnp.dtype(mm_dtype).itemsize

    # Only the activation needs per-call prep (pad + one-time cast to matmul dtype).
    x_res = x.astype(jnp.float32)
    if s_pad != s:
        x_res = jnp.pad(x_res, ((0, 0), (0, s_pad - s)))
    x_mm = x_res if mm_dtype == jnp.float32 else x_res.astype(mm_dtype)

    if tile_s is None:
        tile_s = _choose_tile_s(s_pad, n, mm_bytes, int(0.8 * vmem_limit_bytes))
    assert s_pad % tile_s == 0 and tile_s % LANE == 0
    grid = (s_pad // tile_s,)

    kernel = functools.partial(_residual_mlp_kernel, inv_n=1.0 / float(n))

    def build(x_mm_spec):
        return pl.pallas_call(
            kernel,
            out_shape=jax.ShapeDtypeStruct((n, s_pad), jnp.float32),
            grid_spec=pltpu.PrefetchScalarGridSpec(
                num_scalar_prefetch=0,
                grid=grid,
                in_specs=[
                    pl.BlockSpec((n, tile_s), lambda j: (0, j)),       # x f32 residual tile
                    x_mm_spec,                                         # x (matmul dtype), resident
                    pl.BlockSpec((s_pad, tile_s), lambda j: (0, j)),   # W_t slab (in, out)
                    pl.BlockSpec((1, tile_s), lambda j: (0, j)),       # bias
                    pl.BlockSpec((1, tile_s), lambda j: (0, j)),       # gamma
                    pl.BlockSpec((1, tile_s), lambda j: (0, j)),       # beta
                ],
                out_specs=pl.BlockSpec((n, tile_s), lambda j: (0, j)),  # lane-dense output
            ),
            compiler_params=pltpu.CompilerParams(
                dimension_semantics=("parallel",),
                vmem_limit_bytes=vmem_limit_bytes,
            ),
        )

    args = (x_res, x_mm, params["w_t"], params["bias"], params["gamma"], params["beta"])
    try:
        # Constant block index -> single-buffer the resident matmul copy of x.
        out = build(pl.BlockSpec((n, s_pad), lambda j: (0, 0),
                                 pipeline_mode=pl.Buffered(1)))(*args)
    except Exception:
        # Fallback for JAX/Mosaic versions that reject pipeline_mode here.
        out = build(pl.BlockSpec((n, s_pad), lambda j: (0, 0)))(*args)

    return out[:, :s] if s_pad != s else out


def residual_mlp_ref(x, weight, bias, gamma, beta):
    h = x @ weight.T + bias
    h = jnp.maximum(h, 0.0)
    h = jnp.maximum(h, 0.0)
    mean = jnp.mean(h, axis=0, keepdims=True)
    var = jnp.mean((h - mean) ** 2, axis=0, keepdims=True)
    h = (h - mean) / jnp.sqrt(var + EPS)
    h = h * gamma + beta
    h = jnp.maximum(h, 0.0)
    return x + h


if __name__ == "__main__":
    def run_case(n, size, key):
        kx, kw, kb = jax.random.split(key, 3)
        x = jax.random.normal(kx, (n, size), dtype=jnp.float32)

        # Deterministic parameter init mirroring nn.Linear defaults: U(-1/sqrt(S), 1/sqrt(S))
        bound = 1.0 / (size ** 0.5)
        weight = jax.random.uniform(kw, (size, size), jnp.float32, -bound, bound)  # (out, in)
        bias = jax.random.uniform(kb, (size,), jnp.float32, -bound, bound)
        gamma = jnp.ones((size,), jnp.float32)     # BatchNorm1d affine defaults
        beta = jnp.zeros((size,), jnp.float32)

        ref = residual_mlp_ref(x, weight, bias, gamma, beta)

        # f32 matmul path: strict check against the f32 reference.
        params_f32 = prepare_params(weight, bias, gamma, beta, matmul_dtype=jnp.float32)
        out_f32 = jax.block_until_ready(residual_mlp(x, params_f32))
        assert out_f32.shape == x.shape
        assert jnp.allclose(out_f32, ref, atol=1e-3, rtol=1e-3), \
            f"f32 mismatch (N={n}, S={size})"

        # bf16 matmul path (default): compare against a reference fed the same
        # bf16-rounded matmul inputs (both sides accumulate in f32); the kernel's
        # residual add uses the exact f32 x, so add that correction to the ref.
        params_bf16 = prepare_params(weight, bias, gamma, beta)  # default bf16
        out_bf16 = jax.block_until_ready(residual_mlp(x, params_bf16))
        x_r = x.astype(jnp.bfloat16).astype(jnp.float32)
        w_r = weight.astype(jnp.bfloat16).astype(jnp.float32)
        ref_bf16 = residual_mlp_ref(x_r, w_r, bias, gamma, beta) + (x - x_r)
        assert jnp.allclose(out_bf16, ref_bf16, atol=1e-2, rtol=1e-2), \
            f"bf16 mismatch (N={n}, S={size})"

    key = jax.random.PRNGKey(0)
    k1, k2 = jax.random.split(key)
    run_case(8, 32, k1)     # module-scale case: single feature tile
    run_case(16, 300, k2)   # exercises lane padding + multi-tile "parallel" grid

    print("KERNEL_OK")
</pallas_src>

<mosaic_0001>
module attributes {stable_mosaic.version = 11 : i64} {
  func.func @_residual_mlp_kernel(%arg0: i32, %arg1: memref<8x128xf32, #tpu.memory_space<vmem>>, %arg2: memref<8x128xf32, #tpu.memory_space<vmem>>, %arg3: memref<128x128xf32, #tpu.memory_space<vmem>>, %arg4: memref<1x128xf32, #tpu.memory_space<vmem>>, %arg5: memref<1x128xf32, #tpu.memory_space<vmem>>, %arg6: memref<1x128xf32, #tpu.memory_space<vmem>>, %arg7: memref<8x128xf32, #tpu.memory_space<vmem>>) attributes {dimension_semantics = [#tpu.dimension_semantics<parallel>], iteration_bounds = array<i64: 1>, scalar_prefetch = 0 : i64, scratch_operands = 0 : i64, tpu.core_type = #tpu.core_type<tc>, window_params = [{transform_indices = @transform_0, window_bounds = array<i64: 8, 128>}, {pipeline_mode = #tpu.pipeline_mode<synchronous>, transform_indices = @transform_1, window_bounds = array<i64: 8, 128>}, {transform_indices = @transform_2, window_bounds = array<i64: 128, 128>}, {transform_indices = @transform_3, window_bounds = array<i64: 1, 128>}, {transform_indices = @transform_4, window_bounds = array<i64: 1, 128>}, {transform_indices = @transform_5, window_bounds = array<i64: 1, 128>}, {transform_indices = @transform_6, window_bounds = array<i64: 8, 128>}]} {
    %c0 = arith.constant 0 : index
    %c0_0 = arith.constant 0 : index
    %0 = vector.load %arg2[%c0, %c0_0] : memref<8x128xf32, #tpu.memory_space<vmem>>, vector<8x128xf32>
    %c0_1 = arith.constant 0 : index
    %c0_2 = arith.constant 0 : index
    %1 = vector.load %arg3[%c0_1, %c0_2] : memref<128x128xf32, #tpu.memory_space<vmem>>, vector<128x128xf32>
    %cst = arith.constant dense<0.000000e+00> : vector<8x128xf32>
    %2 = tpu.matmul %0, %1, %cst {dimension_numbers = #tpu.dot_dimension_numbers<[1], [0], [0], [1], [0, 0, 1, 1], [], []>} : vector<8x128xf32>, vector<128x128xf32>, vector<8x128xf32> -> vector<8x128xf32>
    %c0_3 = arith.constant 0 : index
    %c0_4 = arith.constant 0 : index
    %3 = vector.load %arg4[%c0_3, %c0_4] : memref<1x128xf32, #tpu.memory_space<vmem>>, vector<1x128xf32>
    %4 = vector.broadcast %3 : vector<1x128xf32> to vector<8x128xf32>
    %5 = arith.addf %2, %4 : vector<8x128xf32>
    %cst_5 = arith.constant 0.000000e+00 : f32
    %6 = vector.broadcast %cst_5 : f32 to vector<8x128xf32>
    %7 = arith.maximumf %5, %6 : vector<8x128xf32>
    %cst_6 = arith.constant 0.000000e+00 : f32
    %8 = vector.broadcast %cst_6 : f32 to vector<8x128xf32>
    %9 = arith.maximumf %7, %8 : vector<8x128xf32>
    %cst_7 = arith.constant dense<0.000000e+00> : vector<128xf32>
    %10 = vector.multi_reduction <add>, %9, %cst_7 [0] : vector<8x128xf32> to vector<128xf32>
    %11 = vector.shape_cast %10 : vector<128xf32> to vector<1x128xf32>
    %cst_8 = arith.constant 1.250000e-01 : f32
    %12 = vector.broadcast %cst_8 : f32 to vector<1x128xf32>
    %13 = arith.mulf %11, %12 : vector<1x128xf32>
    %14 = vector.broadcast %13 : vector<1x128xf32> to vector<8x128xf32>
    %15 = arith.subf %9, %14 : vector<8x128xf32>
    %16 = arith.mulf %15, %15 : vector<8x128xf32>
    %cst_9 = arith.constant dense<0.000000e+00> : vector<128xf32>
    %17 = vector.multi_reduction <add>, %16, %cst_9 [0] : vector<8x128xf32> to vector<128xf32>
    %18 = vector.shape_cast %17 : vector<128xf32> to vector<1x128xf32>
    %cst_10 = arith.constant 1.250000e-01 : f32
    %19 = vector.broadcast %cst_10 : f32 to vector<1x128xf32>
    %20 = arith.mulf %18, %19 : vector<1x128xf32>
    %c0_11 = arith.constant 0 : index
    %c0_12 = arith.constant 0 : index
    %21 = vector.load %arg5[%c0_11, %c0_12] : memref<1x128xf32, #tpu.memory_space<vmem>>, vector<1x128xf32>
    %cst_13 = arith.constant 9.99999974E-6 : f32
    %22 = vector.broadcast %cst_13 : f32 to vector<1x128xf32>
    %23 = arith.addf %20, %22 : vector<1x128xf32>
    %24 = math.rsqrt %23 : vector<1x128xf32>
    %25 = arith.mulf %21, %24 : vector<1x128xf32>
    %c0_14 = arith.constant 0 : index
    %c0_15 = arith.constant 0 : index
    %26 = vector.load %arg6[%c0_14, %c0_15] : memref<1x128xf32, #tpu.memory_space<vmem>>, vector<1x128xf32>
    %27 = arith.mulf %13, %25 : vector<1x128xf32>
    %28 = arith.subf %26, %27 : vector<1x128xf32>
    %29 = vector.broadcast %25 : vector<1x128xf32> to vector<8x128xf32>
    %30 = arith.mulf %9, %29 : vector<8x128xf32>
    %31 = vector.broadcast %28 : vector<1x128xf32> to vector<8x128xf32>
    %32 = arith.addf %30, %31 : vector<8x128xf32>
    %c0_16 = arith.constant 0 : index
    %c0_17 = arith.constant 0 : index
    %33 = vector.load %arg1[%c0_16, %c0_17] : memref<8x128xf32, #tpu.memory_space<vmem>>, vector<8x128xf32>
    %cst_18 = arith.constant 0.000000e+00 : f32
    %34 = vector.broadcast %cst_18 : f32 to vector<8x128xf32>
    %35 = arith.maximumf %32, %34 : vector<8x128xf32>
    %36 = arith.addf %33, %35 : vector<8x128xf32>
    %c0_19 = arith.constant 0 : index
    %c0_20 = arith.constant 0 : index
    %37 = vector.load %arg7[%c0_19, %c0_20] : memref<8x128xf32, #tpu.memory_space<vmem>>, vector<8x128xf32>
    tpu.vector_store %arg7[%c0_19, %c0_20], %36 {strides = array<i32>} : memref<8x128xf32, #tpu.memory_space<vmem>>, vector<8x128xf32>,
    return
  }
  func.func @transform_0(%arg0: i32) -> (i32, i32) {
    %c0_i32 = arith.constant 0 : i32
    %c0_i32_0 = arith.constant 0 : i32
    return %c0_i32, %arg0 : i32, i32
  }
  func.func @transform_1(%arg0: i32) -> (i32, i32) {
    %c0_i32 = arith.constant 0 : i32
    %c0_i32_0 = arith.constant 0 : i32
    %c0_i32_1 = arith.constant 0 : i32
    return %c0_i32, %c0_i32_0 : i32, i32
  }
  func.func @transform_2(%arg0: i32) -> (i32, i32) {
    %c0_i32 = arith.constant 0 : i32
    %c0_i32_0 = arith.constant 0 : i32
    return %c0_i32, %arg0 : i32, i32
  }
  func.func @transform_3(%arg0: i32) -> (i32, i32) {
    %c0_i32 = arith.constant 0 : i32
    %c0_i32_0 = arith.constant 0 : i32
    return %c0_i32, %arg0 : i32, i32
  }
  func.func @transform_4(%arg0: i32) -> (i32, i32) {
    %c0_i32 = arith.constant 0 : i32
    %c0_i32_0 = arith.constant 0 : i32
    return %c0_i32, %arg0 : i32, i32
  }
  func.func @transform_5(%arg0: i32) -> (i32, i32) {
    %c0_i32 = arith.constant 0 : i32
    %c0_i32_0 = arith.constant 0 : i32
    return %c0_i32, %arg0 : i32, i32
  }
  func.func @transform_6(%arg0: i32) -> (i32, i32) {
    %c0_i32 = arith.constant 0 : i32
    %c0_i32_0 = arith.constant 0 : i32
    return %c0_i32, %arg0 : i32, i32
  }
}

module attributes {stable_mosaic.version = 11 : i64} {
  func.func @_residual_mlp_kernel(%arg0: i32, %arg1: memref<8x128xf32, #tpu.memory_space<vmem>>, %arg2: memref<8x128xf32, #tpu.memory_space<vmem>>, %arg3: memref<128x128xf32, #tpu.memory_space<vmem>>, %arg4: memref<1x128xf32, #tpu.memory_space<vmem>>, %arg5: memref<1x128xf32, #tpu.memory_space<vmem>>, %arg6: memref<1x128xf32, #tpu.memory_space<vmem>>, %arg7: memref<8x128xf32, #tpu.memory_space<vmem>>) attributes {dimension_semantics = [#tpu.dimension_semantics<parallel>], iteration_bounds = array<i64: 1>, scalar_prefetch = 0 : i64, scratch_operands = 0 : i64, tpu.core_type = #tpu.core_type<tc>, window_params = [{transform_indices = @transform_0, window_bounds = array<i64: 8, 128>}, {pipeline_mode = #tpu.pipeline_mode<synchronous>, transform_indices = @transform_1, window_bounds = array<i64: 8, 128>}, {transform_indices = @transform_2, window_bounds = array<i64: 128, 128>}, {transform_indices = @transform_3, window_bounds = array<i64: 1, 128>}, {transform_indices = @transform_4, window_bounds = array<i64: 1, 128>}, {transform_indices = @transform_5, window_bounds = array<i64: 1, 128>}, {transform_indices = @transform_6, window_bounds = array<i64: 8, 128>}]} {
    %c0 = arith.constant 0 : index
    %c0_0 = arith.constant 0 : index
    %0 = vector.load %arg2[%c0, %c0_0] : memref<8x128xf32, #tpu.memory_space<vmem>>, vector<8x128xf32>
    %c0_1 = arith.constant 0 : index
    %c0_2 = arith.constant 0 : index
    %1 = vector.load %arg3[%c0_1, %c0_2] : memref<128x128xf32, #tpu.memory_space<vmem>>, vector<128x128xf32>
    %cst = arith.constant dense<0.000000e+00> : vector<8x128xf32>
    %2 = tpu.matmul %0, %1, %cst {dimension_numbers = #tpu.dot_dimension_numbers<[1], [0], [0], [1], [0, 0, 1, 1], [], []>} : vector<8x128xf32>, vector<128x128xf32>, vector<8x128xf32> -> vector<8x128xf32>
    %c0_3 = arith.constant 0 : index
    %c0_4 = arith.constant 0 : index
    %3 = vector.load %arg4[%c0_3, %c0_4] : memref<1x128xf32, #tpu.memory_space<vmem>>, vector<1x128xf32>
    %4 = vector.broadcast %3 : vector<1x128xf32> to vector<8x128xf32>
    %5 = arith.addf %2, %4 : vector<8x128xf32>
    %cst_5 = arith.constant 0.000000e+00 : f32
    %6 = vector.broadcast %cst_5 : f32 to vector<8x128xf32>
    %7 = arith.maximumf %5, %6 : vector<8x128xf32>
    %cst_6 = arith.constant 0.000000e+00 : f32
    %8 = vector.broadcast %cst_6 : f32 to vector<8x128xf32>
    %9 = arith.maximumf %7, %8 : vector<8x128xf32>
    %cst_7 = arith.constant dense<0.000000e+00> : vector<128xf32>
    %10 = vector.multi_reduction <add>, %9, %cst_7 [0] : vector<8x128xf32> to vector<128xf32>
    %11 = vector.shape_cast %10 : vector<128xf32> to vector<1x128xf32>
    %cst_8 = arith.constant 1.250000e-01 : f32
    %12 = vector.broadcast %cst_8 : f32 to vector<1x128xf32>
    %13 = arith.mulf %11, %12 : vector<1x128xf32>
    %14 = vector.broadcast %13 : vector<1x128xf32> to vector<8x128xf32>
    %15 = arith.subf %9, %14 : vector<8x128xf32>
    %16 = arith.mulf %15, %15 : vector<8x128xf32>
    %cst_9 = arith.constant dense<0.000000e+00> : vector<128xf32>
    %17 = vector.multi_reduction <add>, %16, %cst_9 [0] : vector<8x128xf32> to vector<128xf32>
    %18 = vector.shape_cast %17 : vector<128xf32> to vector<1x128xf32>
    %cst_10 = arith.constant 1.250000e-01 : f32
    %19 = vector.broadcast %cst_10 : f32 to vector<1x128xf32>
    %20 = arith.mulf %18, %19 : vector<1x128xf32>
    %c0_11 = arith.constant 0 : index
    %c0_12 = arith.constant 0 : index
    %21 = vector.load %arg5[%c0_11, %c0_12] : memref<1x128xf32, #tpu.memory_space<vmem>>, vector<1x128xf32>
    %cst_13 = arith.constant 9.99999974E-6 : f32
    %22 = vector.broadcast %cst_13 : f32 to vector<1x128xf32>
    %23 = arith.addf %20, %22 : vector<1x128xf32>
    %24 = math.rsqrt %23 : vector<1x128xf32>
    %25 = arith.mulf %21, %24 : vector<1x128xf32>
    %c0_14 = arith.constant 0 : index
    %c0_15 = arith.constant 0 : index
    %26 = vector.load %arg6[%c0_14, %c0_15] : memref<1x128xf32, #tpu.memory_space<vmem>>, vector<1x128xf32>
    %27 = arith.mulf %13, %25 : vector<1x128xf32>
    %28 = arith.subf %26, %27 : vector<1x128xf32>
    %29 = vector.broadcast %25 : vector<1x128xf32> to vector<8x128xf32>
    %30 = arith.mulf %9, %29 : vector<8x128xf32>
    %31 = vector.broadcast %28 : vector<1x128xf32> to vector<8x128xf32>
    %32 = arith.addf %30, %31 : vector<8x128xf32>
    %c0_16 = arith.constant 0 : index
    %c0_17 = arith.constant 0 : index
    %33 = vector.load %arg1[%c0_16, %c0_17] : memref<8x128xf32, #tpu.memory_space<vmem>>, vector<8x128xf32>
    %cst_18 = arith.constant 0.000000e+00 : f32
    %34 = vector.broadcast %cst_18 : f32 to vector<8x128xf32>
    %35 = arith.maximumf %32, %34 : vector<8x128xf32>
    %36 = arith.addf %33, %35 : vector<8x128xf32>
    %c0_19 = arith.constant 0 : index
    %c0_20 = arith.constant 0 : index
    %37 = vector.load %arg7[%c0_19, %c0_20] : memref<8x128xf32, #tpu.memory_space<vmem>>, vector<8x128xf32>
    tpu.vector_store %arg7[%c0_19, %c0_20], %36 {strides = array<i32>} : memref<8x128xf32, #tpu.memory_space<vmem>>, vector<8x128xf32>,
    return
  }
  func.func @transform_0(%arg0: i32) -> (i32, i32) {
    %c0_i32 = arith.constant 0 : i32
    %c0_i32_0 = arith.constant 0 : i32
    return %c0_i32, %arg0 : i32, i32
  }
  func.func @transform_1(%arg0: i32) -> (i32, i32) {
    %c0_i32 = arith.constant 0 : i32
    %c0_i32_0 = arith.constant 0 : i32
    %c0_i32_1 = arith.constant 0 : i32
    return %c0_i32, %c0_i32_0 : i32, i32
  }
  func.func @transform_2(%arg0: i32) -> (i32, i32) {
    %c0_i32 = arith.constant 0 : i32
    %c0_i32_0 = arith.constant 0 : i32
    return %c0_i32, %arg0 : i32, i32
  }
  func.func @transform_3(%arg0: i32) -> (i32, i32) {
    %c0_i32 = arith.constant 0 : i32
    %c0_i32_0 = arith.constant 0 : i32
    return %c0_i32, %arg0 : i32, i32
  }
  func.func @transform_4(%arg0: i32) -> (i32, i32) {
    %c0_i32 = arith.constant 0 : i32
    %c0_i32_0 = arith.constant 0 : i32
    return %c0_i32, %arg0 : i32, i32
  }
  func.func @transform_5(%arg0: i32) -> (i32, i32) {
    %c0_i32 = arith.constant 0 : i32
    %c0_i32_0 = arith.constant 0 : i32
    return %c0_i32, %arg0 : i32, i32
  }
  func.func @transform_6(%arg0: i32) -> (i32, i32) {
    %c0_i32 = arith.constant 0 : i32
    %c0_i32_0 = arith.constant 0 : i32
    return %c0_i32, %arg0 : i32, i32
  }
}

</mosaic_0001>

<bundles_post_ra>
// kernel: tpu_custom_call.1
= control target key start
LH: loop header
LB: loop body
LE: loop exit
PB: predicated region body
PF: predicated region fallthrough
CT: control target
= control target key end

     0   :  { %11 = vsyncpa [#allocation3], 0  ;;  %s345_s0 = inlined_call_operand.hbm [shape: f32[8,128], index: 0, kind: input, shape index: {}]   ;;  %s346_s1 = inlined_call_operand.hbm [shape: f32[8,128], index: 1, kind: input, shape index: {}]   ;;  %s347_s2 = inlined_call_operand.hbm [shape: f32[128,128], index: 2, kind: input, shape index: {}]   ;;  %s348_s3 = inlined_call_operand.vmem [shape: f32[1,128], index: 3, kind: input, shape index: {}]   ;;  %s349_s4 = inlined_call_operand.vmem [shape: f32[1,128], index: 4, kind: input, shape index: {}]   ;;  %s350_s5 = inlined_call_operand.vmem [shape: f32[1,128], index: 5, kind: input, shape index: {}]   ;;  %s351_s6 = inlined_call_operand.hbm [shape: f32[8,128], index: 6, kind: output, shape index: {}]  }
   0x1   :  { %12 = vsyncpa [#allocation6], 0  ;;  %s30_s23 = sshll.u32 %s346_s1, 4  ;;  %s31_s23 = int_to_ptr.hbm [resolvable:$true] %s30_s23 }
   0x2   :  { %13 = vsyncpa [#allocation4], 0  ;;  %s283_s24 = smov [#allocation5]   ;;  %s19_s28 = sshll.u32 %s345_s0, 4  ;;  %s20_s28 = int_to_ptr.hbm [resolvable:$true] %s19_s28 }
   0x3   :  { %s32_s25 = sshll.u32 %s283_s24, 4  ;;  %s284_s29 = smov [#allocation2]   ;;  %s33_s25 = int_to_ptr.vmem [resolvable:$true] %s32_s25 }
   0x4   :  { %35 = dma.hbm_to_vmem [thread:$0]  %s31_s23, 128, %s33_s25, [#allocation6]  }
   0x5   :  { %s21_s30 = sshll.u32 %s284_s29, 4  ;;  %s40_s9 = sshll.u32 %s347_s2, 4  ;;  %s22_s30 = int_to_ptr.vmem [resolvable:$true] %s21_s30  ;;  %s41_s9 = int_to_ptr.hbm [resolvable:$true] %s40_s9 }
   0x6   :  { %24 = dma.hbm_to_vmem [thread:$0]  %s20_s28, 128, %s22_s30, [#allocation3]  }
   0x7   :  { %s285_s1 = smov [#allocation7]   ;;  %s286_s11 = smov 128  }
   0x8   :  { %s42_s10 = sshll.u32 %s285_s1, 4  ;;  %s287_s12 = smov 8   ;;  %s43_s10 = int_to_ptr.vmem [resolvable:$true] %s42_s10 }
   0x9   :  { %48 = dma.hbm_to_vmem [thread:$0]  %s41_s9, 2048, %s43_s10, [#allocation6], %s286_s11, %s286_s11, %s287_s12  }
   0xa   :  { %277 = dma.done.wait [#allocation3], 128  }
   0xb   :  { %278 = vsyncadd [#allocation3], 4294967168 }
   0xc   :  { %279 = dma.done.wait [#allocation6], 2176  }
   0xd   :  { %280 = vsyncadd [#allocation6], 4294965120  ;;  %v83_v0 = vld [vmem:[#allocation7 + $0x78] sm:$0xff]  ;;  %v82_v1 = vld [vmem:[#allocation7 + $0x70] sm:$0xff]  ;;  %s288_s16 = smov [#allocation8]   ;;  %s161_s19 = sshll.u32 %s351_s6, 4  ;;  %s162_s19 = int_to_ptr.hbm [resolvable:$true] %s161_s19 }
   0xe   :  { %88 = vmatpush.msra.mxu0 %v83_v0  ;;  %v81_v2 = vld [vmem:[#allocation7 + $0x68] sm:$0xff]  ;;  %v80_v3 = vld [vmem:[#allocation7 + $0x60] sm:$0xff]  ;;  %v79_v4 = vld [vmem:[#allocation7 + $0x58] sm:$0xff]  ;;  %s159_s17 = sshll.u32 %s288_s16, 4  ;;  %s160_s17 = int_to_ptr.vmem [resolvable:$true] %s159_s17 }
   0xf   :  { %v78_v5 = vld [vmem:[#allocation7 + $0x50] sm:$0xff]  ;;  %v77_v6 = vld [vmem:[#allocation7 + $0x48] sm:$0xff]  ;;  %v76_v7 = vld [vmem:[#allocation7 + $0x40] sm:$0xff] }
  0x10   :  { %89 = vmatpush.msra.mxu0 %v82_v1  ;;  %v75_v8 = vld [vmem:[#allocation7 + $0x38] sm:$0xff]  ;;  %v74_v9 = vld [vmem:[#allocation7 + $0x30] sm:$0xff]  ;;  %v73_v10 = vld [vmem:[#allocation7 + $0x28] sm:$0xff] }
  0x11   :  { %v72_v11 = vld [vmem:[#allocation7 + $0x20] sm:$0xff]  ;;  %v71_v12 = vld [vmem:[#allocation7 + $0x18] sm:$0xff]  ;;  %v70_v13 = vld [vmem:[#allocation7 + $0x10] sm:$0xff] }
  0x12   :  { %90 = vmatpush.msra.mxu0 %v81_v2  ;;  %v69_v14 = vld [vmem:[#allocation7 + $0x8] sm:$0xff]  ;;  %v68_v15 = vld [vmem:[#allocation7] sm:$0xff]  ;;  %v67_v16 = vld [vmem:[#allocation5] sm:$0xff] }
  0x13   :  { %v178_v17 = vld [vmem:[%s348_s3] ss:$0 sm:$0xff] }
  0x14   :  { %91 = vmatpush.msra.mxu0 %v80_v3  ;;  %v126_v44 = vld [vmem:[%s349_s4] sm:$0x1] }
  0x15   :  { %v139_v48 = vld [vmem:[%s350_s5] sm:$0x1] }
  0x16   :  { %92 = vmatpush.msra.mxu0 %v79_v4  ;;  %v150_v55 = vld [vmem:[#allocation2] sm:$0xff] }
  0x18   :  { %93 = vmatpush.msra.mxu0 %v78_v5 }
  0x1a   :  { %94 = vmatpush.msra.mxu0 %v77_v6 }
  0x1c   :  { %95 = vmatpush.msra.mxu0 %v76_v7 }
  0x1e   :  { %96 = vmatpush.msra.mxu0 %v75_v8 }
  0x20   :  { %97 = vmatpush.msra.mxu0 %v74_v9 }
  0x22   :  { %98 = vmatpush.msra.mxu0 %v73_v10 }
  0x24   :  { %99 = vmatpush.msra.mxu0 %v72_v11 }
  0x26   :  { %100 = vmatpush.msra.mxu0 %v71_v12 }
  0x28   :  { %101 = vmatpush.msra.mxu0 %v70_v13 }
  0x2a   :  { %102 = vmatpush.msra.mxu0 %v69_v14 }
  0x2c   :  { %103 = vmatpush.msra.mxu0 %v68_v15 }
  0x2d   :  { %104 = vmatmul.f32.vlgmr.msra.gmra.mxu0 %v67_v16 }
  0xaa   :  { %v105_v18 = vpop.f32.mrf.mxu0 }
  0xab   :  { %v106_v19 = vadd.f32 %v178_v17, %v105_v18 }
  0xad   :  { %v108_v20 = vmax.f32 %v106_v19, 0.0 }
  0xaf   :  { %v109_v21 = vmax.f32 %v108_v20, 0.0 }
  0xb1   :  { %v110_v22 = vrot.slane %v109_v21, 4 }
  0xb3   :  { %v111_v23 = vadd.f32 %v110_v22, %v109_v21 }
  0xb5   :  { %v112_v24 = vrot.slane %v111_v23, 2 }
  0xb7   :  { %v113_v25 = vadd.f32 %v112_v24, %v111_v23 }
  0xb9   :  { %v114_v26 = vrot.slane %v113_v25, 1 }
  0xbb   :  { %v115_v27 = vadd.f32 %v114_v26, %v113_v25 }
  0xbd   :  { %v116_v28 = vmul.f32 0.125, %v115_v27 }
  0xbf   :  { %v117_v29 = vsub.f32 %v109_v21, %v116_v28 }
  0xc1   :  { %v118_v30 = vmul.f32 %v117_v29, %v117_v29 }
  0xc3   :  { %v119_v31 = vrot.slane %v118_v30, 4 }
  0xc5   :  { %v120_v32 = vadd.f32 %v119_v31, %v118_v30 }
  0xc7   :  { %v121_v33 = vrot.slane %v120_v32, 2 }
  0xc9   :  { %v122_v34 = vadd.f32 %v121_v33, %v120_v32 }
  0xcb   :  { %v123_v35 = vrot.slane %v122_v34, 1 }
  0xcd   :  { %v124_v36 = vadd.f32 %v123_v35, %v122_v34 }
  0xcf   :  { %v125_v37 = vmul.f32 0.125, %v124_v36 }
  0xd1   :  { %v127_v38 = vadd.f32 1e-05, %v125_v37 }
  0xd3   :  { %179 = vrsqrt.f32 %v127_v38  ;;  %vm134_vm1 = vweird.f32 %v127_v38 }
  0xd9   :  { %v180_v39 = vpop.eup %179 }
  0xda   :  { %v129_v40 = vmul.f32 %v180_v39, %v127_v38  ;;  %vm135_vm0 = vweird.f32 %v180_v39 }
  0xdb   :  { %vm136_vm2 = vmor %vm134_vm1, %vm135_vm0 }
  0xdc   :  { %v130_v41 = vmul.f32 %v180_v39, %v129_v40 }
  0xde   :  { %v131_v42 = vmul.f32 0.5, %v130_v41 }
  0xe0   :  { %v132_v43 = vsub.f32 1.5, %v131_v42 }
  0xe2   :  { %v133_v45 = vmul.f32 %v180_v39, %v132_v43 }
  0xe4   :  { %v137_v46 = vsel %vm136_vm2, %v180_v39, %v133_v45 }
  0xe5   :  { %v138_v47 = vmul.f32 %v137_v46, %v126_v44 }
  0xe7   :  { %v143_v49 = vperm.slane %v138_v47, 0  ;;  %v140_v50 = vmul.f32 %v138_v47, %v116_v28 }
  0xe9   :  { %v141_v51 = vsub.f32 %v139_v48, %v140_v50  ;;  %v145_v52 = vmul.f32 %v143_v49, %v109_v21 }
  0xeb   :  { %v147_v53 = vperm.slane %v141_v51, 0 }
  0xed   :  { %v149_v54 = vadd.f32 %v147_v53, %v145_v52 }
  0xef   :  { %v151_v56 = vmax.f32 %v149_v54, 0.0 }
  0xf1   :  { %v152_v57 = vadd.f32 %v151_v56, %v150_v55 }
  0xf3   :  { %153 = vst [vmem:[#allocation8] sm:$0xff] %v152_v57 }
  0xf4   :  { %164 = dma.vmem_to_hbm [thread:$0]  %s160_s17, 128, %s162_s19, [#allocation4]  }
  0xf5   :  { %281 = dma.done.wait [#allocation4], 128  }
  0xf6   :  { %282 = vsyncadd [#allocation4], 4294967168 }
  0xf7   :  { %169 = vsyncpa [#allocation3], 1 }
  0xf8   :  { %170 = vsyncpa [#allocation6], 1 }
  0xf9   :  { %171 = vsyncpa [#allocation4], 1 }

// kernel: tpu_custom_call.1
= control target key start
LH: loop header
LB: loop body
LE: loop exit
PB: predicated region body
PF: predicated region fallthrough
CT: control target
= control target key end

     0   :  { %11 = vsyncpa [#allocation3], 0  ;;  %s345_s0 = inlined_call_operand.hbm [shape: f32[8,128], index: 0, kind: input, shape index: {}]   ;;  %s346_s1 = inlined_call_operand.hbm [shape: f32[8,128], index: 1, kind: input, shape index: {}]   ;;  %s347_s2 = inlined_call_operand.hbm [shape: f32[128,128], index: 2, kind: input, shape index: {}]   ;;  %s348_s3 = inlined_call_operand.vmem [shape: f32[1,128], index: 3, kind: input, shape index: {}]   ;;  %s349_s4 = inlined_call_operand.vmem [shape: f32[1,128], index: 4, kind: input, shape index: {}]   ;;  %s350_s5 = inlined_call_operand.vmem [shape: f32[1,128], index: 5, kind: input, shape index: {}]   ;;  %s351_s6 = inlined_call_operand.hbm [shape: f32[8,128], index: 6, kind: output, shape index: {}]  }
   0x1   :  { %12 = vsyncpa [#allocation6], 0  ;;  %s30_s23 = sshll.u32 %s346_s1, 4  ;;  %s31_s23 = int_to_ptr.hbm [resolvable:$true] %s30_s23 }
   0x2   :  { %13 = vsyncpa [#allocation4], 0  ;;  %s283_s24 = smov [#allocation5]   ;;  %s19_s28 = sshll.u32 %s345_s0, 4  ;;  %s20_s28 = int_to_ptr.hbm [resolvable:$true] %s19_s28 }
   0x3   :  { %s32_s25 = sshll.u32 %s283_s24, 4  ;;  %s284_s29 = smov [#allocation2]   ;;  %s33_s25 = int_to_ptr.vmem [resolvable:$true] %s32_s25 }
   0x4   :  { %35 = dma.hbm_to_vmem [thread:$0]  %s31_s23, 128, %s33_s25, [#allocation6]  }
   0x5   :  { %s21_s30 = sshll.u32 %s284_s29, 4  ;;  %s40_s9 = sshll.u32 %s347_s2, 4  ;;  %s22_s30 = int_to_ptr.vmem [resolvable:$true] %s21_s30  ;;  %s41_s9 = int_to_ptr.hbm [resolvable:$true] %s40_s9 }
   0x6   :  { %24 = dma.hbm_to_vmem [thread:$0]  %s20_s28, 128, %s22_s30, [#allocation3]  }
   0x7   :  { %s285_s1 = smov [#allocation7]   ;;  %s286_s11 = smov 128  }
   0x8   :  { %s42_s10 = sshll.u32 %s285_s1, 4  ;;  %s287_s12 = smov 8   ;;  %s43_s10 = int_to_ptr.vmem [resolvable:$true] %s42_s10 }
   0x9   :  { %48 = dma.hbm_to_vmem [thread:$0]  %s41_s9, 2048, %s43_s10, [#allocation6], %s286_s11, %s286_s11, %s287_s12  }
   0xa   :  { %277 = dma.done.wait [#allocation3], 128  }
   0xb   :  { %278 = vsyncadd [#allocation3], 4294967168 }
   0xc   :  { %279 = dma.done.wait [#allocation6], 2176  }
   0xd   :  { %280 = vsyncadd [#allocation6], 4294965120  ;;  %v83_v0 = vld [vmem:[#allocation7 + $0x78] sm:$0xff]  ;;  %v82_v1 = vld [vmem:[#allocation7 + $0x70] sm:$0xff]  ;;  %s288_s16 = smov [#allocation8]   ;;  %s161_s19 = sshll.u32 %s351_s6, 4  ;;  %s162_s19 = int_to_ptr.hbm [resolvable:$true] %s161_s19 }
   0xe   :  { %88 = vmatpush.msra.mxu0 %v83_v0  ;;  %v81_v2 = vld [vmem:[#allocation7 + $0x68] sm:$0xff]  ;;  %v80_v3 = vld [vmem:[#allocation7 + $0x60] sm:$0xff]  ;;  %v79_v4 = vld [vmem:[#allocation7 + $0x58] sm:$0xff]  ;;  %s159_s17 = sshll.u32 %s288_s16, 4  ;;  %s160_s17 = int_to_ptr.vmem [resolvable:$true] %s159_s17 }
   0xf   :  { %v78_v5 = vld [vmem:[#allocation7 + $0x50] sm:$0xff]  ;;  %v77_v6 = vld [vmem:[#allocation7 + $0x48] sm:$0xff]  ;;  %v76_v7 = vld [vmem:[#allocation7 + $0x40] sm:$0xff] }
  0x10   :  { %89 = vmatpush.msra.mxu0 %v82_v1  ;;  %v75_v8 = vld [vmem:[#allocation7 + $0x38] sm:$0xff]  ;;  %v74_v9 = vld [vmem:[#allocation7 + $0x30] sm:$0xff]  ;;  %v73_v10 = vld [vmem:[#allocation7 + $0x28] sm:$0xff] }
  0x11   :  { %v72_v11 = vld [vmem:[#allocation7 + $0x20] sm:$0xff]  ;;  %v71_v12 = vld [vmem:[#allocation7 + $0x18] sm:$0xff]  ;;  %v70_v13 = vld [vmem:[#allocation7 + $0x10] sm:$0xff] }
  0x12   :  { %90 = vmatpush.msra.mxu0 %v81_v2  ;;  %v69_v14 = vld [vmem:[#allocation7 + $0x8] sm:$0xff]  ;;  %v68_v15 = vld [vmem:[#allocation7] sm:$0xff]  ;;  %v67_v16 = vld [vmem:[#allocation5] sm:$0xff] }
  0x13   :  { %v178_v17 = vld [vmem:[%s348_s3] ss:$0 sm:$0xff] }
  0x14   :  { %91 = vmatpush.msra.mxu0 %v80_v3  ;;  %v126_v44 = vld [vmem:[%s349_s4] sm:$0x1] }
  0x15   :  { %v139_v48 = vld [vmem:[%s350_s5] sm:$0x1] }
  0x16   :  { %92 = vmatpush.msra.mxu0 %v79_v4  ;;  %v150_v55 = vld [vmem:[#allocation2] sm:$0xff] }
  0x18   :  { %93 = vmatpush.msra.mxu0 %v78_v5 }
  0x1a   :  { %94 = vmatpush.msra.mxu0 %v77_v6 }
  0x1c   :  { %95 = vmatpush.msra.mxu0 %v76_v7 }
  0x1e   :  { %96 = vmatpush.msra.mxu0 %v75_v8 }
  0x20   :  { %97 = vmatpush.msra.mxu0 %v74_v9 }
  0x22   :  { %98 = vmatpush.msra.mxu0 %v73_v10 }
  0x24   :  { %99 = vmatpush.msra.mxu0 %v72_v11 }
  0x26   :  { %100 = vmatpush.msra.mxu0 %v71_v12 }
  0x28   :  { %101 = vmatpush.msra.mxu0 %v70_v13 }
  0x2a   :  { %102 = vmatpush.msra.mxu0 %v69_v14 }
  0x2c   :  { %103 = vmatpush.msra.mxu0 %v68_v15 }
  0x2d   :  { %104 = vmatmul.f32.vlgmr.msra.gmra.mxu0 %v67_v16 }
  0xaa   :  { %v105_v18 = vpop.f32.mrf.mxu0 }
  0xab   :  { %v106_v19 = vadd.f32 %v178_v17, %v105_v18 }
  0xad   :  { %v108_v20 = vmax.f32 %v106_v19, 0.0 }
  0xaf   :  { %v109_v21 = vmax.f32 %v108_v20, 0.0 }
  0xb1   :  { %v110_v22 = vrot.slane %v109_v21, 4 }
  0xb3   :  { %v111_v23 = vadd.f32 %v110_v22, %v109_v21 }
  0xb5   :  { %v112_v24 = vrot.slane %v111_v23, 2 }
  0xb7   :  { %v113_v25 = vadd.f32 %v112_v24, %v111_v23 }
  0xb9   :  { %v114_v26 = vrot.slane %v113_v25, 1 }
  0xbb   :  { %v115_v27 = vadd.f32 %v114_v26, %v113_v25 }
  0xbd   :  { %v116_v28 = vmul.f32 0.125, %v115_v27 }
  0xbf   :  { %v117_v29 = vsub.f32 %v109_v21, %v116_v28 }
  0xc1   :  { %v118_v30 = vmul.f32 %v117_v29, %v117_v29 }
  0xc3   :  { %v119_v31 = vrot.slane %v118_v30, 4 }
  0xc5   :  { %v120_v32 = vadd.f32 %v119_v31, %v118_v30 }
  0xc7   :  { %v121_v33 = vrot.slane %v120_v32, 2 }
  0xc9   :  { %v122_v34 = vadd.f32 %v121_v33, %v120_v32 }
  0xcb   :  { %v123_v35 = vrot.slane %v122_v34, 1 }
  0xcd   :  { %v124_v36 = vadd.f32 %v123_v35, %v122_v34 }
  0xcf   :  { %v125_v37 = vmul.f32 0.125, %v124_v36 }
  0xd1   :  { %v127_v38 = vadd.f32 1e-05, %v125_v37 }
  0xd3   :  { %179 = vrsqrt.f32 %v127_v38  ;;  %vm134_vm1 = vweird.f32 %v127_v38 }
  0xd9   :  { %v180_v39 = vpop.eup %179 }
  0xda   :  { %v129_v40 = vmul.f32 %v180_v39, %v127_v38  ;;  %vm135_vm0 = vweird.f32 %v180_v39 }
  0xdb   :  { %vm136_vm2 = vmor %vm134_vm1, %vm135_vm0 }
  0xdc   :  { %v130_v41 = vmul.f32 %v180_v39, %v129_v40 }
  0xde   :  { %v131_v42 = vmul.f32 0.5, %v130_v41 }
  0xe0   :  { %v132_v43 = vsub.f32 1.5, %v131_v42 }
  0xe2   :  { %v133_v45 = vmul.f32 %v180_v39, %v132_v43 }
  0xe4   :  { %v137_v46 = vsel %vm136_vm2, %v180_v39, %v133_v45 }
  0xe5   :  { %v138_v47 = vmul.f32 %v137_v46, %v126_v44 }
  0xe7   :  { %v143_v49 = vperm.slane %v138_v47, 0  ;;  %v140_v50 = vmul.f32 %v138_v47, %v116_v28 }
  0xe9   :  { %v141_v51 = vsub.f32 %v139_v48, %v140_v50  ;;  %v145_v52 = vmul.f32 %v143_v49, %v109_v21 }
  0xeb   :  { %v147_v53 = vperm.slane %v141_v51, 0 }
  0xed   :  { %v149_v54 = vadd.f32 %v147_v53, %v145_v52 }
  0xef   :  { %v151_v56 = vmax.f32 %v149_v54, 0.0 }
  0xf1   :  { %v152_v57 = vadd.f32 %v151_v56, %v150_v55 }
  0xf3   :  { %153 = vst [vmem:[#allocation8] sm:$0xff] %v152_v57 }
  0xf4   :  { %164 = dma.vmem_to_hbm [thread:$0]  %s160_s17, 128, %s162_s19, [#allocation4]  }
  0xf5   :  { %281 = dma.done.wait [#allocation4], 128  }
  0xf6   :  { %282 = vsyncadd [#allocation4], 4294967168 }
  0xf7   :  { %169 = vsyncpa [#allocation3], 1 }
  0xf8   :  { %170 = vsyncpa [#allocation6], 1 }
  0xf9   :  { %171 = vsyncpa [#allocation4], 1 }

</bundles_post_ra>
